<compile_context>
chip_gen: v7x
topology: tpu7x:2x2x1
jax: 0.10.0
libtpu: 0.0.40
codegen_flags: <defaults>
</compile_context>

<pallas_src>
import jax
import jax.numpy as jnp
from jax.experimental import pallas as pl
from jax.experimental.pallas import tpu as pltpu


# ----------------------------- fused kernel --------------------------------

def _make_fused_kernel(n_spatial_tiles: int, hw: int):
    """conv-GEMM(+bias+ReLU) -> avg-pool accumulate -> 3-layer head."""
    inv_hw = 1.0 / float(hw)

    def kernel(p_ref, wc_ref, bc_ref,
               w1_ref, b1_ref, w2_ref, b2_ref, w3_ref, b3_ref,
               o_ref, acc_ref):
        t = pl.program_id(1)

        # Start of this batch row's spatial reduction: zero the pooled sum.
        @pl.when(t == 0)
        def _():
            acc_ref[...] = jnp.zeros_like(acc_ref)

        # conv-as-GEMM for this spatial tile: relu(patches @ Wc + bc)
        patches = p_ref[0]                                    # [TILE_HW, K] bf16
        conv = jnp.dot(patches, wc_ref[...],
                       preferred_element_type=jnp.float32)    # f32 accumulate
        conv = jnp.maximum(conv + bc_ref[...], 0.0)

        # Global-average-pool: accumulate partial sums (mean applied at end).
        acc_ref[...] += jnp.sum(conv, axis=0, keepdims=True)

        # Last spatial tile: finish the pool and run the tiny 3-layer head.
        @pl.when(t == n_spatial_tiles - 1)
        def _():
            pooled = acc_ref[...] * inv_hw                    # [1, C_feat]
            h = jnp.dot(pooled, w1_ref[...],
                        preferred_element_type=jnp.float32) + b1_ref[...]
            h = jnp.maximum(h, 0.0)          # backbone classifier Linear+ReLU
            h = jnp.dot(h, w2_ref[...],
                        preferred_element_type=jnp.float32) + b2_ref[...]
            h = jnp.maximum(h, 0.0)          # SimCLR head Linear+ReLU
            out_row = jnp.dot(h, w3_ref[...],
                              preferred_element_type=jnp.float32) + b3_ref[...]
            o_ref[...] = out_row.reshape(o_ref.shape)         # [1, 1, O]

    return kernel


# ------------------------------ wrapper -------------------------------------

def _pick_tile_hw(hw: int, cap: int = 512) -> int:
    """Largest multiple-of-8 divisor of hw that is <= cap (else hw itself)."""
    if hw <= cap:
        return hw
    for t in range(cap - cap % 8, 7, -8):
        if hw % t == 0:
            return t
    return hw


def im2col_3x3(x_nchw):
    # 3x3, stride 1, padding 1 (PyTorch Conv2d semantics on NCHW input)
    B, C, H, W = x_nchw.shape
    xp = jnp.pad(x_nchw, ((0, 0), (0, 0), (1, 1), (1, 1)))
    cols = []
    for di in range(3):
        for dj in range(3):
            cols.append(xp[:, :, di:di + H, dj:dj + W])       # [B, C, H, W]
    p = jnp.stack(cols, axis=0)                                # [9, B, C, H, W]
    p = p.transpose(1, 3, 4, 2, 0)                             # [B, H, W, C, 9]
    return p.reshape(B, H * W, C * 9)


def simclr_forward(x_nchw, params, tile_hw=None):
    B, C_in, H, W = x_nchw.shape
    HW = H * W
    conv_w = params["conv_w"]                                  # [C_feat, C_in, 3, 3]
    C_feat = conv_w.shape[0]
    D = params["w1"].shape[1]
    O = params["w3"].shape[1]

    # im2col in XLA; big operands in bf16 (f32 accumulation inside the kernel).
    patches = im2col_3x3(x_nchw).astype(jnp.bfloat16)          # [B, HW, C_in*9]
    K = patches.shape[-1]
    wc = conv_w.reshape(C_feat, K).T.astype(jnp.bfloat16)      # [K, C_feat]
    bc = params["conv_b"].reshape(1, C_feat).astype(jnp.float32)

    if tile_hw is None:
        tile_hw = _pick_tile_hw(HW)
    assert HW % tile_hw == 0 and (tile_hw % 8 == 0 or tile_hw == HW)
    n_t = HW // tile_hw

    kernel = _make_fused_kernel(n_spatial_tiles=n_t, hw=HW)

    out = pl.pallas_call(
        kernel,
        out_shape=jax.ShapeDtypeStruct((B, 1, O), jnp.float32),
        grid=(B, n_t),
        in_specs=[
            # Big operand: one (batch, spatial-tile) block of im2col patches.
            pl.BlockSpec((1, tile_hw, K), lambda b, t: (b, t, 0)),
            # Small operands: full blocks, VMEM-resident across the grid.
            pl.BlockSpec((K, C_feat), lambda b, t: (0, 0)),
            pl.BlockSpec((1, C_feat), lambda b, t: (0, 0)),
            pl.BlockSpec((C_feat, D), lambda b, t: (0, 0)),
            pl.BlockSpec((1, D), lambda b, t: (0, 0)),
            pl.BlockSpec((D, D), lambda b, t: (0, 0)),
            pl.BlockSpec((1, D), lambda b, t: (0, 0)),
            pl.BlockSpec((D, O), lambda b, t: (0, 0)),
            pl.BlockSpec((1, O), lambda b, t: (0, 0)),
        ],
        # One output row per batch element; resident across the spatial
        # (reduction) axis and written only on its final step.
        out_specs=pl.BlockSpec((1, 1, O), lambda b, t: (b, 0, 0)),
        scratch_shapes=[pltpu.VMEM((1, C_feat), jnp.float32)],
        compiler_params=pltpu.CompilerParams(
            dimension_semantics=("parallel", "arbitrary"),
            vmem_limit_bytes=32 * 1024 * 1024,
        ),
    )(patches, wc, bc,
      params["w1"], params["b1"], params["w2"], params["b2"],
      params["w3"], params["b3"])

    return out.reshape(B, O)                                   # [B, num_classes]


# ------------------------------ params & reference --------------------------

def init_params(key, c_in=4, c_feat=32, dim_mlp=32, num_classes=16):
    ks = jax.random.split(key, 8)
    s = 0.1
    return {
        "conv_w": jax.random.normal(ks[0], (c_feat, c_in, 3, 3), jnp.float32) * s,
        "conv_b": jax.random.normal(ks[1], (c_feat,), jnp.float32) * s,
        # backbone classifier[0]: Linear(c_feat, dim_mlp)   (stored [in, out])
        "w1": jax.random.normal(ks[2], (c_feat, dim_mlp), jnp.float32) * s,
        "b1": jax.random.normal(ks[3], (1, dim_mlp), jnp.float32) * s,
        # SimCLR head Linear(dim_mlp, dim_mlp)
        "w2": jax.random.normal(ks[4], (dim_mlp, dim_mlp), jnp.float32) * s,
        "b2": jax.random.normal(ks[5], (1, dim_mlp), jnp.float32) * s,
        # original classifier[-1]: Linear(dim_mlp, num_classes)
        "w3": jax.random.normal(ks[6], (dim_mlp, num_classes), jnp.float32) * s,
        "b3": jax.random.normal(ks[7], (1, num_classes), jnp.float32) * s,
    }


def simclr_ref(x_nchw, params):
    # Pure-JAX f32 reference of the same forward pass.
    B, C_in, H, W = x_nchw.shape
    conv_w = params["conv_w"]
    C_feat = conv_w.shape[0]
    patches = im2col_3x3(x_nchw).reshape(B * H * W, C_in * 9)
    conv = jnp.maximum(
        patches @ conv_w.reshape(C_feat, C_in * 9).T + params["conv_b"][None, :], 0.0)
    pooled = conv.reshape(B, H * W, C_feat).mean(axis=1)
    h = jnp.maximum(pooled @ params["w1"] + params["b1"], 0.0)
    h = jnp.maximum(h @ params["w2"] + params["b2"], 0.0)
    return h @ params["w3"] + params["b3"]


if __name__ == "__main__":
    key = jax.random.PRNGKey(0)
    k_x, k_p = jax.random.split(key)

    B, C_in, H, W = 2, 4, 16, 16
    x = jax.random.normal(k_x, (B, C_in, H, W), jnp.float32)   # NCHW, like torch
    params = init_params(k_p, c_in=C_in, c_feat=32, dim_mlp=32, num_classes=16)

    fwd = jax.jit(simclr_forward, static_argnames=("tile_hw",))
    # tile_hw=128 -> 2 spatial reduction steps per batch row; exercises the
    # accumulate/finalize path (larger inputs default to up to 512-row tiles).
    out = jax.block_until_ready(fwd(x, params, tile_hw=128))

    ref = simclr_ref(x, params)
    assert out.shape == (B, 16) and out.dtype == jnp.float32
    assert jnp.allclose(out, ref, atol=2e-2, rtol=2e-2), (
        "max abs err = %f" % float(jnp.max(jnp.abs(out - ref))))
    print("KERNEL_OK")
</pallas_src>

<mosaic_0001>
module attributes {stable_mosaic.version = 11 : i64} {
  func.func @kernel(%arg0: i32, %arg1: i32, %arg2: memref<1x128x36xbf16, #tpu.memory_space<vmem>>, %arg3: memref<36x32xbf16, #tpu.memory_space<vmem>>, %arg4: memref<1x32xf32, #tpu.memory_space<vmem>>, %arg5: memref<32x32xf32, #tpu.memory_space<vmem>>, %arg6: memref<1x32xf32, #tpu.memory_space<vmem>>, %arg7: memref<32x32xf32, #tpu.memory_space<vmem>>, %arg8: memref<1x32xf32, #tpu.memory_space<vmem>>, %arg9: memref<32x16xf32, #tpu.memory_space<vmem>>, %arg10: memref<1x16xf32, #tpu.memory_space<vmem>>, %arg11: memref<1x1x16xf32, #tpu.memory_space<vmem>>, %arg12: memref<1x32xf32, #tpu.memory_space<vmem>>) attributes {dimension_semantics = [#tpu.dimension_semantics<parallel>, #tpu.dimension_semantics<arbitrary>], iteration_bounds = array<i64: 2, 2>, scalar_prefetch = 0 : i64, scratch_operands = 1 : i64, tpu.core_type = #tpu.core_type<tc>, window_params = [{transform_indices = @transform_0, window_bounds = array<i64: 1, 128, 36>}, {pipeline_mode = #tpu.pipeline_mode<synchronous>, transform_indices = @transform_1, window_bounds = array<i64: 36, 32>}, {pipeline_mode = #tpu.pipeline_mode<synchronous>, transform_indices = @transform_2, window_bounds = array<i64: 1, 32>}, {pipeline_mode = #tpu.pipeline_mode<synchronous>, transform_indices = @transform_3, window_bounds = array<i64: 32, 32>}, {pipeline_mode = #tpu.pipeline_mode<synchronous>, transform_indices = @transform_4, window_bounds = array<i64: 1, 32>}, {pipeline_mode = #tpu.pipeline_mode<synchronous>, transform_indices = @transform_5, window_bounds = array<i64: 32, 32>}, {pipeline_mode = #tpu.pipeline_mode<synchronous>, transform_indices = @transform_6, window_bounds = array<i64: 1, 32>}, {pipeline_mode = #tpu.pipeline_mode<synchronous>, transform_indices = @transform_7, window_bounds = array<i64: 32, 16>}, {pipeline_mode = #tpu.pipeline_mode<synchronous>, transform_indices = @transform_8, window_bounds = array<i64: 1, 16>}, {transform_indices = @transform_9, window_bounds = array<i64: 1, 1, 16>}]} {
    %c0_i32 = arith.constant 0 : i32
    %0 = arith.cmpi eq, %arg1, %c0_i32 : i32
    %1 = arith.extui %0 : i1 to i32
    %c0_i32_0 = arith.constant 0 : i32
    %2 = arith.cmpi ne, %1, %c0_i32_0 : i32
    scf.if %2 {
      %cst_14 = arith.constant 0.000000e+00 : f32
      %20 = vector.broadcast %cst_14 : f32 to vector<1x32xf32>
      %c0_15 = arith.constant 0 : index
      %c0_16 = arith.constant 0 : index
      %21 = vector.load %arg12[%c0_15, %c0_16] : memref<1x32xf32, #tpu.memory_space<vmem>>, vector<1x32xf32>
      tpu.vector_store %arg12[%c0_15, %c0_16], %20 {strides = array<i32>} : memref<1x32xf32, #tpu.memory_space<vmem>>, vector<1x32xf32>,
    } else {
    }
    %c0 = arith.constant 0 : index
    %c0_1 = arith.constant 0 : index
    %c0_2 = arith.constant 0 : index
    %3 = vector.load %arg2[%c0, %c0_1, %c0_2] : memref<1x128x36xbf16, #tpu.memory_space<vmem>>, vector<1x128x36xbf16>
    %4 = vector.shape_cast %3 : vector<1x128x36xbf16> to vector<128x36xbf16>
    %c0_3 = arith.constant 0 : index
    %c0_4 = arith.constant 0 : index
    %5 = vector.load %arg3[%c0_3, %c0_4] : memref<36x32xbf16, #tpu.memory_space<vmem>>, vector<36x32xbf16>
    %cst = arith.constant dense<0.000000e+00> : vector<128x32xf32>
    %6 = tpu.matmul %4, %5, %cst {dimension_numbers = #tpu.dot_dimension_numbers<[1], [0], [0], [1], [0, 0, 1, 1], [], []>} : vector<128x36xbf16>, vector<36x32xbf16>, vector<128x32xf32> -> vector<128x32xf32>
    %c0_5 = arith.constant 0 : index
    %c0_6 = arith.constant 0 : index
    %7 = vector.load %arg4[%c0_5, %c0_6] : memref<1x32xf32, #tpu.memory_space<vmem>>, vector<1x32xf32>
    %8 = vector.broadcast %7 : vector<1x32xf32> to vector<128x32xf32>
    %9 = arith.addf %6, %8 : vector<128x32xf32>
    %cst_7 = arith.constant 0.000000e+00 : f32
    %10 = vector.broadcast %cst_7 : f32 to vector<128x32xf32>
    %11 = arith.maximumf %9, %10 : vector<128x32xf32>
    %c0_8 = arith.constant 0 : index
    %c0_9 = arith.constant 0 : index
    %12 = vector.load %arg12[%c0_8, %c0_9] : memref<1x32xf32, #tpu.memory_space<vmem>>, vector<1x32xf32>
    %cst_10 = arith.constant dense<0.000000e+00> : vector<32xf32>
    %13 = vector.multi_reduction <add>, %11, %cst_10 [0] : vector<128x32xf32> to vector<32xf32>
    %14 = vector.shape_cast %13 : vector<32xf32> to vector<1x32xf32>
    %15 = arith.addf %12, %14 : vector<1x32xf32>
    %c0_11 = arith.constant 0 : index
    %c0_12 = arith.constant 0 : index
    %16 = vector.load %arg12[%c0_11, %c0_12] : memref<1x32xf32, #tpu.memory_space<vmem>>, vector<1x32xf32>
    tpu.vector_store %arg12[%c0_11, %c0_12], %15 {strides = array<i32>} : memref<1x32xf32, #tpu.memory_space<vmem>>, vector<1x32xf32>,
    %c1_i32 = arith.constant 1 : i32
    %17 = arith.cmpi eq, %arg1, %c1_i32 : i32
    %18 = arith.extui %17 : i1 to i32
    %c0_i32_13 = arith.constant 0 : i32
    %19 = arith.cmpi ne, %18, %c0_i32_13 : i32
    scf.if %19 {
      %c0_14 = arith.constant 0 : index
      %c0_15 = arith.constant 0 : index
      %20 = vector.load %arg12[%c0_14, %c0_15] : memref<1x32xf32, #tpu.memory_space<vmem>>, vector<1x32xf32>
      %cst_16 = arith.constant 3.906250e-03 : f32
      %21 = vector.broadcast %cst_16 : f32 to vector<1x32xf32>
      %22 = arith.mulf %20, %21 : vector<1x32xf32>
      %c0_17 = arith.constant 0 : index
      %c0_18 = arith.constant 0 : index
      %23 = vector.load %arg5[%c0_17, %c0_18] : memref<32x32xf32, #tpu.memory_space<vmem>>, vector<32x32xf32>
      %cst_19 = arith.constant dense<0.000000e+00> : vector<1x32xf32>
      %24 = tpu.matmul %22, %23, %cst_19 {dimension_numbers = #tpu.dot_dimension_numbers<[1], [0], [0], [1], [0, 0, 1, 1], [], []>} : vector<1x32xf32>, vector<32x32xf32>, vector<1x32xf32> -> vector<1x32xf32>
      %c0_20 = arith.constant 0 : index
      %c0_21 = arith.constant 0 : index
      %25 = vector.load %arg6[%c0_20, %c0_21] : memref<1x32xf32, #tpu.memory_space<vmem>>, vector<1x32xf32>
      %26 = arith.addf %24, %25 : vector<1x32xf32>
      %cst_22 = arith.constant 0.000000e+00 : f32
      %27 = vector.broadcast %cst_22 : f32 to vector<1x32xf32>
      %28 = arith.maximumf %26, %27 : vector<1x32xf32>
      %c0_23 = arith.constant 0 : index
      %c0_24 = arith.constant 0 : index
      %29 = vector.load %arg7[%c0_23, %c0_24] : memref<32x32xf32, #tpu.memory_space<vmem>>, vector<32x32xf32>
      %cst_25 = arith.constant dense<0.000000e+00> : vector<1x32xf32>
      %30 = tpu.matmul %28, %29, %cst_25 {dimension_numbers = #tpu.dot_dimension_numbers<[1], [0], [0], [1], [0, 0, 1, 1], [], []>} : vector<1x32xf32>, vector<32x32xf32>, vector<1x32xf32> -> vector<1x32xf32>
      %c0_26 = arith.constant 0 : index
      %c0_27 = arith.constant 0 : index
      %31 = vector.load %arg8[%c0_26, %c0_27] : memref<1x32xf32, #tpu.memory_space<vmem>>, vector<1x32xf32>
      %32 = arith.addf %30, %31 : vector<1x32xf32>
      %cst_28 = arith.constant 0.000000e+00 : f32
      %33 = vector.broadcast %cst_28 : f32 to vector<1x32xf32>
      %34 = arith.maximumf %32, %33 : vector<1x32xf32>
      %c0_29 = arith.constant 0 : index
      %c0_30 = arith.constant 0 : index
      %35 = vector.load %arg9[%c0_29, %c0_30] : memref<32x16xf32, #tpu.memory_space<vmem>>, vector<32x16xf32>
      %cst_31 = arith.constant dense<0.000000e+00> : vector<1x16xf32>
      %36 = tpu.matmul %34, %35, %cst_31 {dimension_numbers = #tpu.dot_dimension_numbers<[1], [0], [0], [1], [0, 0, 1, 1], [], []>} : vector<1x32xf32>, vector<32x16xf32>, vector<1x16xf32> -> vector<1x16xf32>
      %c0_32 = arith.constant 0 : index
      %c0_33 = arith.constant 0 : index
      %37 = vector.load %arg10[%c0_32, %c0_33] : memref<1x16xf32, #tpu.memory_space<vmem>>, vector<1x16xf32>
      %38 = arith.addf %36, %37 : vector<1x16xf32>
      %39 = vector.shape_cast %38 : vector<1x16xf32> to vector<1x1x16xf32>
      %c0_34 = arith.constant 0 : index
      %c0_35 = arith.constant 0 : index
      %c0_36 = arith.constant 0 : index
      %40 = vector.load %arg11[%c0_34, %c0_35, %c0_36] : memref<1x1x16xf32, #tpu.memory_space<vmem>>, vector<1x1x16xf32>
      tpu.vector_store %arg11[%c0_34, %c0_35, %c0_36], %39 {strides = array<i32>} : memref<1x1x16xf32, #tpu.memory_space<vmem>>, vector<1x1x16xf32>,
    } else {
    }
    return
  }
  func.func @transform_0(%arg0: i32, %arg1: i32) -> (i32, i32, i32) {
    %c0_i32 = arith.constant 0 : i32
    %c0_i32_0 = arith.constant 0 : i32
    return %arg0, %arg1, %c0_i32 : i32, i32, i32
  }
  func.func @transform_1(%arg0: i32, %arg1: i32) -> (i32, i32) {
    %c0_i32 = arith.constant 0 : i32
    %c0_i32_0 = arith.constant 0 : i32
    %c0_i32_1 = arith.constant 0 : i32
    return %c0_i32, %c0_i32_0 : i32, i32
  }
  func.func @transform_2(%arg0: i32, %arg1: i32) -> (i32, i32) {
    %c0_i32 = arith.constant 0 : i32
    %c0_i32_0 = arith.constant 0 : i32
    %c0_i32_1 = arith.constant 0 : i32
    return %c0_i32, %c0_i32_0 : i32, i32
  }
  func.func @transform_3(%arg0: i32, %arg1: i32) -> (i32, i32) {
    %c0_i32 = arith.constant 0 : i32
    %c0_i32_0 = arith.constant 0 : i32
    %c0_i32_1 = arith.constant 0 : i32
    return %c0_i32, %c0_i32_0 : i32, i32
  }
  func.func @transform_4(%arg0: i32, %arg1: i32) -> (i32, i32) {
    %c0_i32 = arith.constant 0 : i32
    %c0_i32_0 = arith.constant 0 : i32
    %c0_i32_1 = arith.constant 0 : i32
    return %c0_i32, %c0_i32_0 : i32, i32
  }
  func.func @transform_5(%arg0: i32, %arg1: i32) -> (i32, i32) {
    %c0_i32 = arith.constant 0 : i32
    %c0_i32_0 = arith.constant 0 : i32
    %c0_i32_1 = arith.constant 0 : i32
    return %c0_i32, %c0_i32_0 : i32, i32
  }
  func.func @transform_6(%arg0: i32, %arg1: i32) -> (i32, i32) {
    %c0_i32 = arith.constant 0 : i32
    %c0_i32_0 = arith.constant 0 : i32
    %c0_i32_1 = arith.constant 0 : i32
    return %c0_i32, %c0_i32_0 : i32, i32
  }
  func.func @transform_7(%arg0: i32, %arg1: i32) -> (i32, i32) {
    %c0_i32 = arith.constant 0 : i32
    %c0_i32_0 = arith.constant 0 : i32
    %c0_i32_1 = arith.constant 0 : i32
    return %c0_i32, %c0_i32_0 : i32, i32
  }
  func.func @transform_8(%arg0: i32, %arg1: i32) -> (i32, i32) {
    %c0_i32 = arith.constant 0 : i32
    %c0_i32_0 = arith.constant 0 : i32
    %c0_i32_1 = arith.constant 0 : i32
    return %c0_i32, %c0_i32_0 : i32, i32
  }
  func.func @transform_9(%arg0: i32, %arg1: i32) -> (i32, i32, i32) {
    %c0_i32 = arith.constant 0 : i32
    %c0_i32_0 = arith.constant 0 : i32
    %c0_i32_1 = arith.constant 0 : i32
    return %arg0, %c0_i32, %c0_i32_0 : i32, i32, i32
  }
}

</mosaic_0001>

<bundles_post_ra>
// kernel: simclr_forward.1
= control target key start
LH: loop header
LB: loop body
LE: loop exit
PB: predicated region body
PF: predicated region fallthrough
CT: control target
= control target key end

     0   :  { %14 = vsyncpa [#allocation4], 0  ;;  %s1593_s0 = inlined_call_operand.vmem [shape: bf16[2,256,36], index: 0, kind: input, shape index: {}]   ;;  %s1594_s1 = inlined_call_operand.vmem [shape: bf16[36,32], index: 1, kind: input, shape index: {}]   ;;  %s1595_s2 = inlined_call_operand.vmem [shape: f32[1,32], index: 2, kind: input, shape index: {}]   ;;  %s1596_s3 = inlined_call_operand.vmem [shape: f32[32,32], index: 3, kind: input, shape index: {}]   ;;  %s1597_s4 = inlined_call_operand.vmem [shape: f32[1,32], index: 4, kind: input, shape index: {}]   ;;  %s1598_s5 = inlined_call_operand.vmem [shape: f32[32,32], index: 5, kind: input, shape index: {}]   ;;  %s1599_s6 = inlined_call_operand.vmem [shape: f32[1,32], index: 6, kind: input, shape index: {}]   ;;  %s1600_s7 = inlined_call_operand.vmem [shape: f32[32,16], index: 7, kind: input, shape index: {}]   ;;  %s1601_s8 = inlined_call_operand.vmem [shape: f32[1,16], index: 8, kind: input, shape index: {}]   ;;  %s1602_s9 = inlined_call_operand.hbm [shape: f32[2,1,16], index: 9, kind: output, shape index: {}]  }
   0x1   :  { %16 = vsyncpa [#allocation4 + $0x1], 0  ;;  %s1341_s30 = smov 0   ;;  %s1343_s10 = smov 0  }
   0x2   :  { %s1345_s11 = smov 0   ;;  %s1347_s12 = smov 0  }
   0x3   :  { %s1349_s13 = smov 0   ;;  %s1351_s14 = smov 0  }
   0x4   :  { %s1353_s15 = smov 0   ;;  %s1355_s16 = smov 0  }
   0x5 LB: > { %1606 = sst [smem:[#allocation6_spill]] %s1276_s14  ;;  %s961_s17 = sadd.s32 4294967295, %s1284_s16   ;;  %s1284_s16 = sphi %s1355_s16, %s22_s16   ;;  %s1280_s15 = sphi %s1353_s15, %s1615_s15   ;;  %s1276_s14 = sphi %s1351_s14, %s1614_s14   ;;  %s1272_s13 = sphi %s1349_s13, %s1613_s13   ;;  %s1268_s12 = sphi %s1347_s12, %s1612_s12   ;;  %s1264_s11 = sphi %s1345_s11, %s1618_s11   ;;  %s1260_s10 = sphi %s1343_s10, %s1617_s10   ;;  %s1256_s30 = sphi %s1341_s30, %s1616_s30  }
   0x6   : > { %1607 = sst [smem:[#allocation7_spill]] %s1280_s15  ;;  %s962_s18 = sadd.s32 4294967294, %s1284_s16  }
   0x7   : > { %s31_s19 = sadd.s32 1, %s1276_s14  ;;  %s34_s20 = sadd.s32 1, %s1280_s15 }
   0x8   : > { %p32_p0 = scmp.ge.s32.totalorder %s31_s19, 2  ;;  %p247_p1 = scmp.ne.s32.totalorder %s1264_s11, %s1260_s10 }
   0x9   : > { %p248_p2 = scmp.eq.s32.totalorder %s961_s17, 3  ;;  %p253_p4 = scmp.ne.s32.totalorder %s1260_s10, %s1256_s30 }
   0xa   : > { %s1620_s19 = smov (%p32_p0, %s31_s19), 0  ;;  %s1622_s20 = smov (!%p32_p0, %s34_s20), %s1280_s15 }
   0xb   : > { %1608 = sst [smem:[#allocation8_spill]] %s1620_s19  ;;  %p1390_p3 = por %p248_p2, %p247_p1 }
   0xc   : > { %p36_p5 = scmp.ge.s32.totalorder %s1622_s20, 2  ;;  %p254_p6 = scmp.eq.s32.totalorder %s962_s18, 3 }
   0xd   : > { %p965_p7 = scmp.ge.s32.totalorder %s1284_s16, 1  ;;  %p309_p8 = scmp.lt.s32.totalorder %s1284_s16, 5 }
   0xe   : > { %s1624_s20 = smov (%p36_p5, %s1622_s20), 0  ;;  %p1400_p9 = por %p254_p6, %p253_p4 }
   0xf   : > { %1610 = sst [smem:[#allocation9_spill]] %s1624_s20  ;;  %p310_p10 = pnand %p965_p7, %p309_p8 }
  0x10   : > { %s234_s23 = ssub.s32 %s1280_s15, %s1624_s20  ;;  %s237_s24 = sadd.s32 1, %s1264_s11 }
  0x11   : > { %p235_p11 = scmp.eq.s32.totalorder %s234_s23, 0  ;;  %313 = sbr.rel (%p310_p10) target bundleno = 990 (0x3de), region = 56 }
  0x12   : > { %s346_s26 = sand.u32 (!%p310_p10), 1, %s1260_s10   ;;  %s966_s27 = sshll.u32 (!%p310_p10), %s1268_s12, 4 }
  0x13   : > { %s1408_s25 = scalar_select %p235_p11, %s1264_s11, %s237_s24  }
  0x14   : > { %p349_p12 = scmp.lt.s32.totalorder (!%p310_p10), %s1272_s13, 1  ;;  %p351_p13 = scmp.lt.s32.totalorder (!%p310_p10), %s966_s27, 31 }
  0x15   : > { %s1421_s24 = scalar_lea.vmem (!%p310_p10), [#allocation3], %s346_s26  ;;  %p969_p0 = scmp.ne.s32.totalorder (!%p310_p10), %s1268_s12, 0 }
  0x18   : > { %s350_s28 = scalar_select %p349_p12, %s1272_s13, 1 }
  0x19   : > { %s1626_s27 = smov (!%p351_p13, %s966_s27), 31  ;;  %362 = sbr.rel (%p969_p0) target bundleno = 32 (0x20), region = 60 }
  0x1a   : > { %s967_s29 = sshll.u32 %s350_s28, 5  ;;  %vm363_vm0 = vcmask (!%p969_p0), 253952   ;;  %v1286_v0 = vmov (!%p969_p0), 0.0  }
  0x1b   : > { %s354_s17 = sadd.s32 %s967_s29, %s1626_s27  ;;  %364 = vst.msk [vmem:[#allocation2] sm:$0x1] (!%p969_p0), %vm363_vm0, %v1286_v0 }
  0x1c   : > { %s968_s18 = sshll.u32 %s354_s17, 2 }
  0x1d   : > { %s1417_s23 = scalar_lea.vmem %s1593_s0, %s968_s18 }
  0x20 PF: > { %v1179_v1 = vld [vmem:[%s1594_s1] sm:$0xff]   ;;  %v1180_v2 = vld [vmem:[%s1594_s1 + $0x8] sm:$0xff]   ;;  %vm448_vm1 = vcmask 293888   ;;  %v1181_v3 = vld [vmem:[%s1594_s1 + $0x10] ss:$0 sps:$4 sm:$0x33]  }
  0x21   : > { %1023 = vmatprep.subr.bf16.mxu0 %v1179_v1  ;;  %v1182_v4 = vld [vmem:[%s1417_s23] sm:$0xff]   ;;  %1096 = vmatprep.subr.bf16.mxu1 %v1179_v1  ;;  %vm473_vm2 = vcmask 1041408   ;;  %v1183_v7 = vld [vmem:[%s1417_s23 + $0x8] sm:$0xff]   ;;  %v1184_v9 = vld [vmem:[%s1417_s23 + $0x10] sm:$0xff]   ;;  %vm591_vm3 = vcmask 261120   ;;  %vm630_vm4 = vcmask 253952  }
  0x22   : > { %1024 = vmatpush3.bf16.msra.mxu0 %v1179_v1  ;;  %1099 = vmatpush3.bf16.msra.mxu1 %v1179_v1  ;;  %v1186_v5 = vld [vmem:[%s1417_s23 + $0x20] sm:$0xff]   ;;  %v475_v6 = vsel %vm473_vm2, %v1181_v3, 0  ;;  %v1187_v8 = vld [vmem:[%s1417_s23 + $0x28] sm:$0xff]   ;;  %v1188_v10 = vld [vmem:[%s1417_s23 + $0x30] sm:$0xff]   ;;  %p990_p1 = scmp.ne.s32.totalorder %s1268_s12, 1 }
  0x23   : > { %1025 = vmatprep.subr.bf16.mxu0 %v1180_v2  ;;  %1029 = vmatprep.mubr.msk.bf16.mxu0 %vm448_vm1, %v1182_v4  ;;  %v1185_v11 = vld [vmem:[%s1417_s23 + $0x18] sm:$0xff]   ;;  %v1452_v13 = vld [vmem:[%s1595_s2] ss:$0 sm:$0xff]  ;;  %vm1288_vm5 = vmmov (!%p990_p1), 0   ;;  %vm874_vm6 = vcmask (!%p990_p1), 122880  }
  0x24   : > { %1097 = vmatprep.subr.bf16.mxu1 %v1180_v2  ;;  %1037 = vmatprep.mubr.msk.bf16.mxu1 %vm448_vm1, %v1186_v5  ;;  %v1189_v12 = vld [vmem:[%s1417_s23 + $0x38] sm:$0xff]  }
  0x26   : > { %1026 = vmatpush3.bf16.msra.mxu0 %v1180_v2  ;;  %1100 = vmatpush3.bf16.msra.mxu1 %v1180_v2 }
  0x27   : > { %1102 = vmatprep.subr.msk.bf16.mxu0 %vm473_vm2, %v1181_v3  ;;  %1103 = vmatprep.subr.msk.bf16.mxu1 %vm473_vm2, %v1181_v3 }
  0x2a   : > { %1028 = vmatpush3.bf16.msra.mxu0 %v475_v6  ;;  %1101 = vmatpush3.bf16.msra.mxu1 %v475_v6 }
  0x2d   : > { %1030 = vmatmul.mubr.msk.bf16.vlgmr.msra.gmra.mrb[0].mxu0 %vm448_vm1, %v1183_v7  ;;  %1038 = vmatmul.mubr.msk.bf16.vlgmr.msra.gmra.mrb[0].mxu1 %vm448_vm1, %v1187_v8 }
  0x2e   : > { %1033 = vmatprep.mubr.msk.bf16.mxu0 %vm448_vm1, %v1184_v9  ;;  %1041 = vmatprep.mubr.msk.bf16.mxu1 %vm448_vm1, %v1188_v10 }
  0x35   : > { %1034 = vmatmul.mubr.msk.bf16.gmra.mrb[4].mxu0 %vm448_vm1, %v1185_v11  ;;  %1042 = vmatmul.mubr.msk.bf16.gmra.mrb[4].mxu1 %vm448_vm1, %v1189_v12 }
 0x100   : > { %v1031_v14 = vpop.f32.mrb[0].mxu0  ;;  %v1039_v15 = vpop.f32.mrb[0].mxu1 }
 0x101   : > { %v511_v16 = vpop.f32.mrb[1].mxu0  ;;  %v543_v17 = vpop.f32.mrb[1].mxu1  ;;  %v520_v18 = vadd.f32 %v1031_v14, %v1452_v13  ;;  %v552_v61 = vadd.f32 %v1039_v15, %v1452_v13 }
 0x102   : > { %v512_v19 = vadd.f32 %v1452_v13, %v511_v16  ;;  %v1032_v20 = vpop.f32.mrb[2].mxu0  ;;  %v1040_v21 = vpop.f32.mrb[2].mxu1  ;;  %v544_v44 = vadd.f32 %v1452_v13, %v543_v17 }
 0x103   : > { %v514_v22 = vpop.f32.mrb[3].mxu0  ;;  %v546_v23 = vpop.f32.mrb[3].mxu1  ;;  %v523_v25 = vadd.f32 %v1032_v20, %v1452_v13  ;;  %v576_v27 = vmax.f32 %v520_v18, 0.0  ;;  %v555_v63 = vadd.f32 %v1040_v21, %v1452_v13  ;;  %v584_v5 = vmax.f32 %v552_v61, 0.0  ;;  %v798_v61 = vld [vmem:[%s1600_s7 + $0x10] sm:$0xff] (!%p990_p1) }
 0x104   : > { %v574_v24 = vmax.f32 %v512_v19, 0.0  ;;  %v515_v26 = vadd.f32 %v1452_v13, %v514_v22  ;;  %v582_v57 = vmax.f32 %v544_v44, 0.0  ;;  %v547_v58 = vadd.f32 %v1452_v13, %v546_v23  ;;  %v717_v44 = vld [vmem:[%s1598_s5] sm:$0xff] (!%p990_p1) }
 0x105   : > { %v577_v30 = vmax.f32 %v523_v25, 0.0  ;;  %v595_v37 = vsel %vm591_vm3, %v576_v27, 0.0  ;;  %v585_v7 = vmax.f32 %v555_v63, 0.0  ;;  %v611_v12 = vsel %vm591_vm3, %v584_v5, 0.0  ;;  %v800_v5 = vld [vmem:[%s1601_s8] sm:$0x1] (!%p990_p1) }
 0x106   : > { %v575_v28 = vmax.f32 %v515_v26, 0.0  ;;  %v592_v29 = vsel %vm591_vm3, %v574_v24, 0.0  ;;  %v607_v1 = vsel %vm591_vm3, %v582_v57, 0.0  ;;  %v583_v2 = vmax.f32 %v547_v58, 0.0 }
 0x107   : > { %v597_v46 = vsel %vm591_vm3, %v577_v30, 0.0  ;;  %v613_v16 = vsel %vm591_vm3, %v585_v7, 0.0 }
 0x108   : > { %v593_v31 = vsel %vm591_vm3, %v575_v28, 0.0  ;;  %v1035_v32 = vpop.f32.mrb[4].mxu0  ;;  %v1043_v33 = vpop.f32.mrb[4].mxu1  ;;  %v609_v8 = vsel %vm591_vm3, %v583_v2, 0.0 }
 0x109   : > { %v594_v34 = vadd.f32 %v593_v31, %v592_v29  ;;  %v527_v35 = vpop.f32.mrb[5].mxu0  ;;  %v559_v36 = vpop.f32.mrb[5].mxu1  ;;  %v536_v38 = vadd.f32 %v1035_v32, %v1452_v13  ;;  %v568_v14 = vadd.f32 %v1043_v33, %v1452_v13 }
 0x10a   : > { %v528_v39 = vadd.f32 %v1452_v13, %v527_v35  ;;  %v1036_v40 = vpop.f32.mrb[6].mxu0  ;;  %v1044_v41 = vpop.f32.mrb[6].mxu1  ;;  %v560_v3 = vadd.f32 %v1452_v13, %v559_v36 }
 0x10b   : > { %v596_v42 = vadd.f32 %v595_v37, %v594_v34  ;;  %v530_v43 = vpop.f32.mrb[7].mxu0  ;;  %v562_v45 = vpop.f32.mrb[7].mxu1  ;;  %v539_v48 = vadd.f32 %v1036_v40, %v1452_v13  ;;  %v580_v51 = vmax.f32 %v536_v38, 0.0  ;;  %v571_v18 = vadd.f32 %v1044_v41, %v1452_v13  ;;  %v638_v37 = vld [vmem:[%s1596_s3] sm:$0xff] (!%p990_p1)  ;;  %v639_v38 = vld [vmem:[%s1596_s3 + $0x8] sm:$0xff] (!%p990_p1) }
 0x10c   : > { %v578_v47 = vmax.f32 %v528_v39, 0.0  ;;  %v531_v49 = vadd.f32 %v1452_v13, %v530_v43  ;;  %v586_v9 = vmax.f32 %v560_v3, 0.0  ;;  %v563_v10 = vadd.f32 %v1452_v13, %v562_v45  ;;  %v590_v13 = vld [vmem:[#allocation2] sm:$0x1]  ;;  %v640_v39 = vld [vmem:[%s1596_s3 + $0x10] sm:$0xff] (!%p990_p1)  ;;  %v718_v45 = vld [vmem:[%s1598_s5 + $0x8] sm:$0xff] (!%p990_p1) }
 0x10d   : > { %v598_v50 = vadd.f32 %v597_v46, %v596_v42  ;;  %v581_v55 = vmax.f32 %v539_v48, 0.0  ;;  %v603_v60 = vsel %vm591_vm3, %v580_v51, 0.0  ;;  %v588_v21 = vmax.f32 %v568_v14, 0.0  ;;  %v641_v42 = vld [vmem:[%s1596_s3 + $0x18] sm:$0xff] (!%p990_p1) }
 0x10e   : > { %v599_v52 = vsel %vm591_vm3, %v578_v47, 0.0  ;;  %v579_v53 = vmax.f32 %v531_v49, 0.0  ;;  %v615_v17 = vsel %vm591_vm3, %v586_v9, 0.0  ;;  %v587_v19 = vmax.f32 %v563_v10, 0.0  ;;  %v720_v51 = vld [vmem:[%s1598_s5 + $0x18] sm:$0xff] (!%p990_p1) }
 0x10f   : > { %v600_v54 = vadd.f32 %v599_v52, %v598_v50  ;;  %v605_v0 = vsel %vm591_vm3, %v581_v55, 0.0  ;;  %v589_v23 = vmax.f32 %v571_v18, 0.0  ;;  %v619_v26 = vsel %vm591_vm3, %v588_v21, 0.0  ;;  %v719_v50 = vld [vmem:[%s1598_s5 + $0x10] sm:$0xff] (!%p990_p1) }
 0x110   : > { %v601_v56 = vsel %vm591_vm3, %v579_v53, 0.0  ;;  %v617_v24 = vsel %vm591_vm3, %v587_v19, 0.0  ;;  %v1287_v40 = vmov (!%p990_p1), 0.0|0.0   ;;  %v1079_v41 = vpack.c.bf16 (!%p990_p1), %v639_v38, %v638_v37  ;;  %v796_v53 = vld [vmem:[%s1600_s7] sm:$0xff] (!%p990_p1) }
 0x111   : > { %v602_v59 = vadd.f32 %v601_v56, %v600_v54  ;;  %v621_v28 = vsel %vm591_vm3, %v589_v23, 0.0  ;;  %1078 = vmatprep.subr.bf16.mxu0 (!%p990_p1), %v1287_v40  ;;  %v1289_v43 = vmov (!%p990_p1), 0.0   ;;  %1084 = vmatprep.subr.bf16.mxu1 (!%p990_p1), %v1287_v40  ;;  %v1082_v46 = vpack.c.bf16 (!%p990_p1), %v641_v42, %v640_v39  ;;  %v797_v54 = vld [vmem:[%s1600_s7 + $0x8] sm:$0xff] (!%p990_p1)  ;;  %v642_v56 = vld [vmem:[%s1597_s4] sm:$0x1] (!%p990_p1) }
 0x112   : > { %1053 = vmatprep.mubr.msk.f32.mxu0 (!%p990_p1), %vm1288_vm5, %v1289_v43  ;;  %1064 = vmatprep.mubr.msk.f32.mxu1 (!%p990_p1), %vm1288_vm5, %v1289_v43  ;;  %v1085_v48 = vpack.c.bf16 (!%p990_p1), %v718_v45, %v717_v44  ;;  %v1088_v52 = vpack.c.bf16 (!%p990_p1), %v720_v51, %v719_v50  ;;  %v1091_v55 = vpack.c.bf16 (!%p990_p1), %v797_v54, %v796_v53 }
 0x113   : > { %v604_v62 = vadd.f32 %v603_v60, %v602_v59  ;;  %1080 = vmatpush3.bf16.msra.mxu0 (!%p990_p1), %v1079_v41 }
 0x114   : > { %1081 = vmatprep.subr.bf16.mxu0 (!%p990_p1), %v1287_v40  ;;  %1086 = vmatpush3.bf16.msra.mxu1 (!%p990_p1), %v1085_v48 }
 0x115   : > { %v606_v4 = vadd.f32 %v605_v0, %v604_v62  ;;  %1087 = vmatprep.subr.bf16.mxu1 (!%p990_p1), %v1287_v40  ;;  %v799_v62 = vld [vmem:[%s1600_s7 + $0x18] sm:$0xff] (!%p990_p1)  ;;  %v721_v0 = vld [vmem:[%s1599_s6] sm:$0x1] (!%p990_p1) }
 0x116   : > { %v1094_v63 = vpack.c.bf16 (!%p990_p1), %v799_v62, %v798_v61 }
 0x117   : > { %v608_v6 = vadd.f32 %v607_v1, %v606_v4  ;;  %1083 = vmatpush3.bf16.msra.mxu0 (!%p990_p1), %v1082_v46 }
 0x118   : > { %1090 = vmatprep.subr.bf16.mxu0 (!%p990_p1), %v1287_v40  ;;  %1089 = vmatpush3.bf16.msra.mxu1 (!%p990_p1), %v1088_v52 }
 0x119   : > { %v610_v11 = vadd.f32 %v609_v8, %v608_v6 }
 0x11b   : > { %v612_v15 = vadd.f32 %v611_v12, %v610_v11 }
 0x11d   : > { %v614_v20 = vadd.f32 %v613_v16, %v612_v15 }
 0x11f   : > { %v616_v22 = vadd.f32 %v615_v17, %v614_v20 }
 0x121   : > { %v618_v25 = vadd.f32 %v617_v24, %v616_v22 }
 0x123   : > { %v620_v27 = vadd.f32 %v619_v26, %v618_v25 }
 0x125   : > { %v622_v29 = vadd.f32 %v621_v28, %v620_v27 }
 0x127   : > { %v623_v30 = vrot.slane %v622_v29, 4 }
 0x129   : > { %v624_v31 = vadd.f32 %v623_v30, %v622_v29 }
 0x12b   : > { %v625_v32 = vrot.slane %v624_v31, 2 }
 0x12d   : > { %v626_v33 = vadd.f32 %v625_v32, %v624_v31 }
 0x12f   : > { %v627_v34 = vrot.slane %v626_v33, 1  ;;  %635 = sbr.rel (%p990_p1) target bundleno = 966 (0x3c6), region = 64 }
 0x131   : > { %v628_v35 = vadd.f32 %v627_v34, %v626_v33 }
 0x133   : > { %v629_v36 = vadd.f32 %v628_v35, %v590_v13 }
 0x135   : > { %631 = vst.msk [vmem:[#allocation2] sm:$0x1] %vm630_vm4, %v629_v36 }
 0x13c   : > { %v636_v47 = vld [vmem:[#allocation2] sm:$0x1] }
 0x13d   : > { %v637_v49 = vmul.f32 0.00390625, %v636_v47 }
 0x13f   : > { %1054 = vmatmul.mubr.msk.f32.vlgmr.msra.gmra.mrb[0].mxu0 %vm591_vm3, %v637_v49 }
 0x140   : > { %1075 = vmatprep.mubr.msk.f32.mxu0 %vm1288_vm5, %v1289_v43  ;;  %1092 = vmatpush3.bf16.msra.mxu0 %v1091_v55 }
 0x141   : > { %1093 = vmatprep.subr.bf16.mxu0 %v1287_v40 }
 0x144   : > { %1095 = vmatpush3.bf16.msra.mxu0 %v1094_v63 }
 0x212   : > { %v712_v57 = vpop.f32.mrb[0].mxu0 }
 0x213   : > { %v713_v58 = vadd.f32 %v712_v57, %v642_v56  ;;  %v1055_v59 = vpop.f32.mrb[1].mxu0 }
 0x215   : > { %v716_v60 = vmax.f32 %v713_v58, 0.0 }
 0x217   : > { %1065 = vmatmul.mubr.msk.f32.vlgmr.msra.gmra.mrb[0].mxu1 %vm591_vm3, %v716_v60 }
 0x2ea   : > { %v791_v1 = vpop.f32.mrb[0].mxu1 }
 0x2eb   : > { %v792_v2 = vadd.f32 %v791_v1, %v721_v0  ;;  %v1066_v3 = vpop.f32.mrb[1].mxu1 }
 0x2ed   : > { %v795_v4 = vmax.f32 %v792_v2, 0.0 }
 0x2ef   : > { %1076 = vmatmul.mubr.msk.f32.vlgmr.msra.gmra.mrb[2].mxu0 %vm591_vm3, %v795_v4 }
 0x3c2   : > { %v870_v6 = vpop.f32.mrb[2].mxu0 }
 0x3c3   : > { %v871_v7 = vadd.f32 %v870_v6, %v800_v5  ;;  %v1077_v8 = vpop.f32.mrb[3].mxu0 }
 0x3c5   : > { %875 = vst.msk [vmem:[%s1421_s24] sm:$0x1] %vm874_vm6, %v871_v7 }
 0x3c6 PF: > { %s994_s12 = sshll.u32 %s1272_s13, 4  ;;  %s889_s17 = sshll.u32 %s1421_s24, 4  ;;  %s890_s17 = int_to_ptr.vmem [resolvable:$true] %s889_s17 }
 0x3c7   : > { %s1543_s29 = scalar_lea.hbm %s1602_s9, %s994_s12  ;;  %s877_s18 = scalar_lea.sflag [#allocation4], %s346_s26 }
 0x3c8   : > { %s1190_s23 = scalar_lea.vmem %s890_s17, 16  ;;  %s1290_s27 = smov [#allocation3]  }
 0x3c9   : > { %p1191_p2 = scmp.ne.s32.totalorder %s890_s17, %s1190_s23  ;;  %s1194_s19 = sshll.u32 %s1290_s27, 4  ;;  %s1195_s19 = int_to_ptr.vmem [resolvable:$false] %s1194_s19 }
 0x3ca   : > { %s1196_s20 = scalar_lea.vmem %s1195_s19, 32  ;;  %p1197_p6 = scmp.lt.s32.totalorder %s890_s17, %s1195_s19 }
 0x3cb   : > { %p1192_p4 = pnand %p1191_p2, %p1390_p3  ;;  %p1198_p7 = scmp.lt.s32.totalorder %s1196_s20, %s1190_s23 }
 0x3cd   : > { %p1193_p5 = pneg %p1192_p4  ;;  %p1199_p8 = por %p1198_p7, %p1197_p6 }
 0x3cf   : > { %p1200_p10 = pnand %p1199_p8, %p1193_p5 }
 0x3d1   : > { %1203 = shalt.err (!%p1200_p10)
}
 0x3d2   : > { %s1204_s13 = scalar_lea.hbm %s1543_s29, 16  ;;  %s1208_s28 = scalar_lea.hbm %s1602_s9, 32 }
 0x3d3   : > { %p1205_p11 = scmp.ne.s32.totalorder %s1543_s29, %s1204_s13  ;;  %p1209_p0 = scmp.lt.u32.totalorder %s1543_s29, %s1602_s9 }
 0x3d4   : > { %p1210_p1 = scmp.lt.u32.totalorder %s1208_s28, %s1204_s13  ;;  %p1212_p4 = scmp.lt.u32.totalorder %s1204_s13, %s1543_s29 }
 0x3d5   : > { %p1206_p12 = pnand %p1205_p11, %p1390_p3 }
 0x3d6   : > { %p1211_p2 = por %p1210_p1, %p1209_p0 }
 0x3d7   : > { %p1207_p13 = pneg %p1206_p12 }
 0x3d8   : > { %p1213_p5 = por %p1212_p4, %p1211_p2 }
 0x3da   : > { %p1214_p6 = pnand %p1213_p5, %p1207_p13 }
 0x3dc   : > { %1217 = shalt.err (!%p1214_p6)
}
 0x3dd   : > { %1104 = dma.vmem_to_hbm [thread:$0]  (%p1390_p3), %s890_s17, 16, %s1543_s29, %s877_s18  }
 0x3de PF: > { %p1110_p7 = scmp.ge.s32.totalorder %s1284_s16, 2  ;;  %s901_s15 = sand.u32 1, %s1256_s30  }
 0x3df   : > { %s902_s23 = scalar_lea.sflag [#allocation4], %s901_s15 }
 0x3e0   : > { %p1107_p8 = pnand %p1110_p7, %p1400_p9 }
 0x3e2   : > { %1251 = dma.done.wait (!%p1107_p8), %s902_s23, 16  }
 0x3e3   : > { %1253 = vsyncadd (!%p1107_p8), %s902_s23, 4294967280  ;;  %s22_s16 = sadd.s32 1, %s1284_s16   ;;  %s1612_s12 = sld [smem:[#allocation6_spill]] }
 0x3e4   : > { %p19_p10 = scmp.ge.s32.totalorder %s22_s16, 6   ;;  %s1613_s13 = sld [smem:[#allocation7_spill]] }
 0x3e5   : > { %s1614_s14 = sld [smem:[#allocation8_spill]]  ;;  %s1615_s15 = sld [smem:[#allocation9_spill]] }
 0x3e6   : > { %s1616_s30 = smov %s1260_s10  ;;  %s1617_s10 = smov %s1264_s11 }
 0x3e7   : > { %s1618_s11 = smov %s1408_s25  ;;  %21 = sbr.rel (!%p19_p10) target bundleno = 5 (0x5), region = 99 }
 0x3ee   :  { %906 = vsyncpa [#allocation4], 1 }
 0x3ef   :  { %908 = vsyncpa [#allocation4 + $0x1], 1 }

</bundles_post_ra>
